<compile_context>
chip_gen: v7x
topology: tpu7x:2x2x1
jax: 0.10.0
libtpu: 0.0.40
codegen_flags: <defaults>
</compile_context>

<pallas_src>
import math

import jax
import jax.numpy as jnp
from jax import lax
from jax.experimental import pallas as pl
from jax.experimental.pallas import tpu as pltpu


INPUT_SIZE = 36
HIDDEN_SIZE = 18
OUTPUT_SIZE = 1
HIDDEN_AUG = HIDDEN_SIZE + 1        # hidden rows + the propagated "ones" row (bias fold)


def _round_up(v, m):
    return (v + m - 1) // m * m


# ---------------------------------------------------------------------------
# Parameter packing: one small f32 buffer (single DMA, VMEM-resident).
# Biases are folded into the matmuls:
#   layer 1:   W1_aug = [[W1], [0]]       (19, 36),  b1_aug = [b1; 1] stored in col 36
#   layers 2/3: W_aug = [[W, b], [0, 1]]  (19, 19)   -> propagates the ones row
#   layer 4:   W4_aug = [W4, b4]          (1, 19)
# Sub-blocks start on 8-row (f32 sublane) boundaries.
# ---------------------------------------------------------------------------
_ROW_STRIDE = _round_up(HIDDEN_AUG, 8)                      # 24
_ROW_OFFSETS = (0, _ROW_STRIDE, 2 * _ROW_STRIDE, 3 * _ROW_STRIDE)
_PACK_ROWS = 3 * _ROW_STRIDE + _round_up(OUTPUT_SIZE, 8)    # 80
_PACK_COLS = INPUT_SIZE + 1                                 # 37 (layer-1 weights | b1_aug)
_B1_COL = INPUT_SIZE


def pack_params(params):
    buf = jnp.zeros((_PACK_ROWS, _PACK_COLS), dtype=jnp.float32)
    # layer 1: W1 in rows 0:18 / cols 0:36, augmented bias column [b1; 1] in col 36
    buf = buf.at[0:HIDDEN_SIZE, 0:INPUT_SIZE].set(params["w1"].astype(jnp.float32))
    buf = buf.at[0:HIDDEN_SIZE, _B1_COL].set(params["b1"].astype(jnp.float32))
    buf = buf.at[HIDDEN_SIZE, _B1_COL].set(1.0)
    # layers 2, 3: bias folded as an extra weight column; extra row keeps the ones row alive
    for li, r in ((2, _ROW_OFFSETS[1]), (3, _ROW_OFFSETS[2])):
        buf = buf.at[r:r + HIDDEN_SIZE, 0:HIDDEN_SIZE].set(params[f"w{li}"].astype(jnp.float32))
        buf = buf.at[r:r + HIDDEN_SIZE, HIDDEN_SIZE].set(params[f"b{li}"].astype(jnp.float32))
        buf = buf.at[r + HIDDEN_SIZE, HIDDEN_SIZE].set(1.0)
    # layer 4: [W4 | b4]
    r = _ROW_OFFSETS[3]
    buf = buf.at[r:r + OUTPUT_SIZE, 0:HIDDEN_SIZE].set(params["w4"].astype(jnp.float32))
    buf = buf.at[r:r + OUTPUT_SIZE, HIDDEN_SIZE].set(params["b4"].astype(jnp.float32))
    return buf


# ---------------------------------------------------------------------------
# Kernel.  x tile is batch-major (tile_b, 36); the first matmul contracts on
# x's minor dim ("A @ B.T" form) which flips the layout to feature-major
# (rows, tile_b), so PReLU / later matmuls are lane-dense and the output tile
# (1, tile_b) stores unmasked.
# ---------------------------------------------------------------------------
def fnn_kernel(alpha_ref, p_ref, x_ref, o_ref):
    x = x_ref[...]                                                # (tile_b, 36)

    r = _ROW_OFFSETS[0]
    w1 = p_ref[r:r + HIDDEN_AUG, 0:INPUT_SIZE]                    # (19, 36)
    b1 = p_ref[r:r + HIDDEN_AUG, _B1_COL:_B1_COL + 1]             # (19, 1) = [b1; 1]
    h = lax.dot_general(w1, x, (((1,), (1,)), ((), ())),
                        preferred_element_type=jnp.float32) + b1  # (19, tile_b)
    h = jnp.where(h >= 0.0, h, alpha_ref[0] * h)                  # PReLU; ones row stays 1

    for li, r in ((1, _ROW_OFFSETS[1]), (2, _ROW_OFFSETS[2])):
        w = p_ref[r:r + HIDDEN_AUG, 0:HIDDEN_AUG]                 # (19, 19), bias folded
        h = jnp.dot(w, h, preferred_element_type=jnp.float32)
        h = jnp.where(h >= 0.0, h, alpha_ref[li] * h)

    r = _ROW_OFFSETS[3]
    w4 = p_ref[r:r + OUTPUT_SIZE, 0:HIDDEN_AUG]                   # (1, 19) = [W4 | b4]
    o_ref[...] = jnp.dot(w4, h,
                         preferred_element_type=jnp.float32).astype(o_ref.dtype)


def fnn_forward(x, params, *, tile_b=16384):
    """x: (B, 36) f32 -> (B, 1) f32 (eval-mode forward; dropout is identity)."""
    B = x.shape[0]
    assert x.shape[1] == INPUT_SIZE

    # Effective batch tile: big enough to amortize per-grid-step overhead,
    # small enough to fit every generation's scoped VMEM (double-buffered x
    # tile ~2x2.4 MB at 16384), and capped near B/2 so the grid has >=2 steps
    # when possible (v7x megacore sharding of the "parallel" batch axis).
    tb = max(128, min(tile_b, _round_up(-(-B // 2), 128)))
    grid = (pl.cdiv(B, tb),)   # partial last block: OOB output lanes are discarded

    x = x.astype(jnp.float32)
    pbuf = pack_params(params)
    alphas = jnp.stack([jnp.asarray(params[f"a{i}"], jnp.float32).reshape(())
                        for i in (1, 2, 3)])

    flops = 2 * (INPUT_SIZE * HIDDEN_SIZE + 2 * HIDDEN_SIZE * HIDDEN_SIZE
                 + HIDDEN_SIZE * OUTPUT_SIZE) * B
    bytes_accessed = (INPUT_SIZE + OUTPUT_SIZE) * 4 * B + pbuf.size * 4

    out = pl.pallas_call(
        fnn_kernel,
        out_shape=jax.ShapeDtypeStruct((1, B), jnp.float32),
        grid_spec=pltpu.PrefetchScalarGridSpec(
            num_scalar_prefetch=1,            # PReLU alphas -> SMEM scalars
            grid=grid,
            in_specs=[
                # packed params: constant block index -> fetched once, VMEM-resident
                pl.BlockSpec((_PACK_ROWS, _PACK_COLS), lambda i, a: (0, 0)),
                # x: batch-major, tiled along batch -> auto double-buffered pipeline
                pl.BlockSpec((tb, INPUT_SIZE), lambda i, a: (i, 0)),
            ],
            out_specs=pl.BlockSpec((1, tb), lambda i, a: (0, i)),
        ),
        compiler_params=pltpu.CompilerParams(
            dimension_semantics=("parallel",)),
        cost_estimate=pl.CostEstimate(flops=flops, transcendentals=0,
                                      bytes_accessed=bytes_accessed),
    )(alphas, pbuf, x)

    return out.reshape(B, OUTPUT_SIZE)


# ---------------------------------------------------------------------------
# Init (PyTorch-style: W is (out, in), uniform +-1/sqrt(fan_in), alpha=0.25)
# and pure-JAX reference.
# ---------------------------------------------------------------------------
def init_params(key, input_size=INPUT_SIZE, hidden_size=HIDDEN_SIZE,
                output_size=OUTPUT_SIZE):
    sizes = [(input_size, hidden_size),
             (hidden_size, hidden_size),
             (hidden_size, hidden_size),
             (hidden_size, output_size)]
    params = {}
    keys = jax.random.split(key, 2 * len(sizes))
    for idx, (fan_in, fan_out) in enumerate(sizes):
        bound = 1.0 / math.sqrt(fan_in)
        params[f"w{idx + 1}"] = jax.random.uniform(
            keys[2 * idx], (fan_out, fan_in), minval=-bound, maxval=bound,
            dtype=jnp.float32)
        params[f"b{idx + 1}"] = jax.random.uniform(
            keys[2 * idx + 1], (fan_out,), minval=-bound, maxval=bound,
            dtype=jnp.float32)
    for i in (1, 2, 3):
        params[f"a{i}"] = jnp.array(0.25, dtype=jnp.float32)
    return params


def fnn_reference(x, params):
    def prelu(h, a):
        return jnp.where(h >= 0.0, h, a * h)
    h = prelu(x @ params["w1"].T + params["b1"], params["a1"])
    h = prelu(h @ params["w2"].T + params["b2"], params["a2"])
    h = prelu(h @ params["w3"].T + params["b3"], params["a3"])
    return h @ params["w4"].T + params["b4"]


if __name__ == "__main__":
    key = jax.random.PRNGKey(0)
    k_param, k_x = jax.random.split(key)

    B = 300   # deliberately not a multiple of the batch tile -> exercises partial block
    params = init_params(k_param)
    x = jax.random.normal(k_x, (B, INPUT_SIZE), dtype=jnp.float32)

    y = jax.block_until_ready(fnn_forward(x, params))
    y_ref = fnn_reference(x, params)

    assert y.shape == (B, OUTPUT_SIZE), y.shape
    assert jnp.allclose(y, y_ref, atol=1e-4, rtol=1e-4), "mismatch vs reference"

    print("KERNEL_OK")
</pallas_src>

<mosaic_0001>
module attributes {stable_mosaic.version = 11 : i64} {
  func.func @fnn_kernel(%arg0: i32, %arg1: memref<3xf32, #tpu.memory_space<smem>>, %arg2: memref<80x37xf32, #tpu.memory_space<vmem>>, %arg3: memref<256x36xf32, #tpu.memory_space<vmem>>, %arg4: memref<1x256xf32, #tpu.memory_space<vmem>>) attributes {dimension_semantics = [#tpu.dimension_semantics<parallel>], iteration_bounds = array<i64: 2>, scalar_prefetch = 1 : i64, scratch_operands = 0 : i64, tpu.core_type = #tpu.core_type<tc>, window_params = [{pipeline_mode = #tpu.pipeline_mode<synchronous>, transform_indices = @transform_0, window_bounds = array<i64: 80, 37>}, {transform_indices = @transform_1, window_bounds = array<i64: 256, 36>}, {transform_indices = @transform_2, window_bounds = array<i64: 1, 256>}]} {
    %c0 = arith.constant 0 : index
    %c0_0 = arith.constant 0 : index
    %0 = vector.load %arg3[%c0, %c0_0] : memref<256x36xf32, #tpu.memory_space<vmem>>, vector<256x36xf32>
    %c0_1 = arith.constant 0 : index
    %c0_2 = arith.constant 0 : index
    %1 = vector.load %arg2[%c0_1, %c0_2] : memref<80x37xf32, #tpu.memory_space<vmem>>, vector<19x36xf32>
    %c0_3 = arith.constant 0 : index
    %c36 = arith.constant 36 : index
    %2 = vector.load %arg2[%c0_3, %c36] : memref<80x37xf32, #tpu.memory_space<vmem>>, vector<19x1xf32>
    %cst = arith.constant dense<0.000000e+00> : vector<19x256xf32>
    %3 = tpu.matmul %1, %0, %cst {dimension_numbers = #tpu.dot_dimension_numbers<[1], [1], [0], [0], [0, 0, 1, 0], [], []>} : vector<19x36xf32>, vector<256x36xf32>, vector<19x256xf32> -> vector<19x256xf32>
    %4 = vector.broadcast %2 : vector<19x1xf32> to vector<19x256xf32>
    %5 = arith.addf %3, %4 : vector<19x256xf32>
    %cst_4 = arith.constant 0.000000e+00 : f32
    %6 = vector.broadcast %cst_4 : f32 to vector<19x256xf32>
    %7 = arith.cmpf oge, %5, %6 : vector<19x256xf32>
    %c0_5 = arith.constant 0 : index
    %8 = memref.load %arg1[%c0_5] : memref<3xf32, #tpu.memory_space<smem>>
    %9 = vector.broadcast %8 : f32 to vector<19x256xf32>
    %10 = arith.mulf %9, %5 : vector<19x256xf32>
    %11 = arith.select %7, %5, %10 : vector<19x256xi1>, vector<19x256xf32>
    %c24 = arith.constant 24 : index
    %c0_6 = arith.constant 0 : index
    %12 = vector.load %arg2[%c24, %c0_6] : memref<80x37xf32, #tpu.memory_space<vmem>>, vector<19x19xf32>
    %cst_7 = arith.constant dense<0.000000e+00> : vector<19x256xf32>
    %13 = tpu.matmul %12, %11, %cst_7 {dimension_numbers = #tpu.dot_dimension_numbers<[1], [0], [0], [1], [0, 0, 1, 1], [], []>} : vector<19x19xf32>, vector<19x256xf32>, vector<19x256xf32> -> vector<19x256xf32>
    %cst_8 = arith.constant 0.000000e+00 : f32
    %14 = vector.broadcast %cst_8 : f32 to vector<19x256xf32>
    %15 = arith.cmpf oge, %13, %14 : vector<19x256xf32>
    %c1 = arith.constant 1 : index
    %16 = memref.load %arg1[%c1] : memref<3xf32, #tpu.memory_space<smem>>
    %17 = vector.broadcast %16 : f32 to vector<19x256xf32>
    %18 = arith.mulf %17, %13 : vector<19x256xf32>
    %19 = arith.select %15, %13, %18 : vector<19x256xi1>, vector<19x256xf32>
    %c48 = arith.constant 48 : index
    %c0_9 = arith.constant 0 : index
    %20 = vector.load %arg2[%c48, %c0_9] : memref<80x37xf32, #tpu.memory_space<vmem>>, vector<19x19xf32>
    %cst_10 = arith.constant dense<0.000000e+00> : vector<19x256xf32>
    %21 = tpu.matmul %20, %19, %cst_10 {dimension_numbers = #tpu.dot_dimension_numbers<[1], [0], [0], [1], [0, 0, 1, 1], [], []>} : vector<19x19xf32>, vector<19x256xf32>, vector<19x256xf32> -> vector<19x256xf32>
    %cst_11 = arith.constant 0.000000e+00 : f32
    %22 = vector.broadcast %cst_11 : f32 to vector<19x256xf32>
    %23 = arith.cmpf oge, %21, %22 : vector<19x256xf32>
    %c2 = arith.constant 2 : index
    %24 = memref.load %arg1[%c2] : memref<3xf32, #tpu.memory_space<smem>>
    %25 = vector.broadcast %24 : f32 to vector<19x256xf32>
    %26 = arith.mulf %25, %21 : vector<19x256xf32>
    %27 = arith.select %23, %21, %26 : vector<19x256xi1>, vector<19x256xf32>
    %c72 = arith.constant 72 : index
    %c0_12 = arith.constant 0 : index
    %28 = vector.load %arg2[%c72, %c0_12] : memref<80x37xf32, #tpu.memory_space<vmem>>, vector<1x19xf32>
    %cst_13 = arith.constant dense<0.000000e+00> : vector<1x256xf32>
    %29 = tpu.matmul %28, %27, %cst_13 {dimension_numbers = #tpu.dot_dimension_numbers<[1], [0], [0], [1], [0, 0, 1, 1], [], []>} : vector<1x19xf32>, vector<19x256xf32>, vector<1x256xf32> -> vector<1x256xf32>
    %c0_14 = arith.constant 0 : index
    %c0_15 = arith.constant 0 : index
    %30 = vector.load %arg4[%c0_14, %c0_15] : memref<1x256xf32, #tpu.memory_space<vmem>>, vector<1x256xf32>
    tpu.vector_store %arg4[%c0_14, %c0_15], %29 {strides = array<i32>} : memref<1x256xf32, #tpu.memory_space<vmem>>, vector<1x256xf32>,
    return
  }
  func.func @transform_0(%arg0: i32, %arg1: memref<3xf32, #tpu.memory_space<smem>>) -> (i32, i32) {
    %c0_i32 = arith.constant 0 : i32
    %c0_i32_0 = arith.constant 0 : i32
    %c0_i32_1 = arith.constant 0 : i32
    return %c0_i32, %c0_i32_0 : i32, i32
  }
  func.func @transform_1(%arg0: i32, %arg1: memref<3xf32, #tpu.memory_space<smem>>) -> (i32, i32) {
    %c0_i32 = arith.constant 0 : i32
    %c0_i32_0 = arith.constant 0 : i32
    return %arg0, %c0_i32 : i32, i32
  }
  func.func @transform_2(%arg0: i32, %arg1: memref<3xf32, #tpu.memory_space<smem>>) -> (i32, i32) {
    %c0_i32 = arith.constant 0 : i32
    %c0_i32_0 = arith.constant 0 : i32
    return %c0_i32, %arg0 : i32, i32
  }
}

</mosaic_0001>

<bundles_post_ra>
// kernel: tpu_custom_call.1
= control target key start
LH: loop header
LB: loop body
LE: loop exit
PB: predicated region body
PF: predicated region fallthrough
CT: control target
= control target key end

     0   :  { %s1426_s0 = inlined_call_operand.vmem [shape: f32[3], index: 0, kind: input, shape index: {}]   ;;  %s1427_s1 = inlined_call_operand.vmem [shape: f32[80,37], index: 1, kind: input, shape index: {}]   ;;  %s1428_s2 = inlined_call_operand.vmem [shape: f32[300,36], index: 2, kind: input, shape index: {}]   ;;  %s1429_s3 = inlined_call_operand.hbm [shape: f32[1,300], index: 3, kind: output, shape index: {}]  }
   0x1   :  { %s8_s14 = sshll.u32 %s1426_s0, 4  ;;  %s9_s14 = int_to_ptr.vmem [resolvable:$true] %s8_s14 }
   0x2   :  { %s1066_s15 = scalar_lea.vmem %s9_s14, 16  ;;  %p1071_p1 = scmp.lt.s32.totalorder %s9_s14, %s9_s14 }
   0x3   :  { %p1067_p0 = scmp.ne.s32.totalorder %s9_s14, %s1066_s15  ;;  %p1072_p2 = scmp.lt.s32.totalorder %s1066_s15, %s1066_s15 }
   0x5   :  { %p1073_p3 = por %p1072_p2, %p1071_p1 }
   0x7   :  { %p1074_p4 = pnand %p1073_p3, %p1067_p0 }
   0x9   :  { %1077 = shalt.err (!%p1074_p4)  }
   0xa   :  { %s1144_s16 = smov [#allocation3]  }
   0xb   :  { %11 = dma.vmem_to_smem %s9_s14, 16, %s1144_s16, [#allocation2] }
   0xc   :  { %1122 = dma.done.wait [#allocation2], 16 }
   0xd   :  { %1123 = vsyncadd [#allocation2], 4294967280 }
   0xe   :  { %13 = sfence }
   0xf   :  { %14 = vsyncpa [#allocation5], 0 }
  0x10   :  { %16 = vsyncpa [#allocation5 + $0x1], 0  ;;  %s1172_s17 = smov 0   ;;  %s1174_s18 = smov 0  }
  0x11   :  { %s1176_s0 = smov 0   ;;  %s1178_s19 = smov 0  }
  0x12 LB: > { %s1193_s20 = sadd.s32 4294967295, %s1142_s19   ;;  %s859_s21 = sadd.s32 4294967294, %s1142_s19   ;;  %s1142_s19 = sphi %s1178_s19, %s1437_s19   ;;  %s1138_s0 = sphi %s1176_s0, %s1436_s0   ;;  %s1134_s18 = sphi %s1174_s18, %s1435_s18   ;;  %s1130_s17 = sphi %s1172_s17, %s1434_s17  }
  0x13   : > { %s1197_s22 = sadd.s32 1, %s1142_s19   ;;  %s76_s23 = sadd.s32 1, %s1138_s0 }
  0x14   : > { %s73_s24 = ssub.s32 %s1142_s19, %s1197_s22  ;;  %p86_p5 = scmp.ne.s32.totalorder %s1138_s0, %s1134_s18 }
  0x15   : > { %p74_p6 = scmp.eq.s32.totalorder %s73_s24, 0  ;;  %p87_p7 = scmp.eq.s32.totalorder %s1193_s20, 1 }
  0x16   : > { %p92_p8 = scmp.ne.s32.totalorder %s1134_s18, %s1130_s17  ;;  %p93_p9 = scmp.eq.s32.totalorder %s859_s21, 1 }
  0x17   : > { %s1208_s25 = scalar_select %p74_p6, %s1138_s0, %s76_s23  }
  0x18   : > { %p1210_p10 = por %p87_p7, %p86_p5  ;;  %p1214_p11 = por %p93_p9, %p92_p8 }
  0x19   : > { %p862_p12 = scmp.ge.s32.totalorder %s1142_s19, 1  ;;  %p131_p13 = scmp.lt.s32.totalorder %s1142_s19, 3 }
  0x1b   : > { %p132_p0 = pnand %p862_p12, %p131_p13 }
  0x1c   : > { %s1221_s28 = sshll.u32 (!%p132_p0), %s1193_s20, 5  ;;  %vm226_vm0 = vcmask (!%p132_p0), 293888   ;;  %v1226_v0 = vld [vmem:[%s1427_s1] sm:$0xff] (!%p132_p0)  ;;  %v1234_v1 = vld [vmem:[%s1427_s1 + $0x10] sm:$0x7] (!%p132_p0)  ;;  %v1145_v2 = vmov (!%p132_p0), 36  }
  0x1d   : > { %135 = sbr.rel (%p132_p0) target bundleno = 1040 (0x410), region = 28  ;;  %p162_p1 = scmp.lt.s32.totalorder (!%p132_p0), %s1221_s28, 37  ;;  %956 = vmatprep.mubr.msk.f32.mxu0 (!%p132_p0), %vm226_vm0, %v1226_v0  ;;  %1064 = vset.pattern.permute.xlu0 (!%p132_p0), %v1145_v2  ;;  %vm1246_vm1 = vmpackc.low (!%p132_p0), %vm226_vm0, %vm226_vm0  ;;  %v1253_v4 = vld [vmem:[%s1427_s1 + $0x8] sm:$0xff] (!%p132_p0)  ;;  %v1146_v53 = vmov (!%p132_p0), 0.0   ;;  %vm445_vm7 = vcmask (!%p132_p0), 1042432   ;;  %vm435_vm9 = vcmask (!%p132_p0), 154624  }
  0x1e   : > { %1065 = vset.pattern.permute.xlu1 (!%p132_p0), %v1145_v2  ;;  %213 = vperm.xlu0 (!%p132_p0), %1064, %v1226_v0   ;;  %s418_s13 = sld [smem:[#allocation3]] (!%p132_p0)  ;;  %s906_s29 = sld [smem:[#allocation3 + $0x1]] (!%p132_p0) }
  0x1f   : > { %223 = vperm.xlu1 (!%p132_p0), %1065, %v1234_v1   ;;  %516 = vmatprep.mubr.f32.mxu1 (!%p132_p0), %v1146_v53  ;;  %s912_s9 = sld [smem:[#allocation3 + $0x2]] (!%p132_p0)  ;;  %s154_s12 = sand.u32 (!%p132_p0), 1, %s1134_s18  }
  0x20   : > { %s1372_s15 = scalar_lea.sflag (!%p132_p0), [#allocation5], %s154_s12 }
  0x22   : > { %218 = vperm.xlu0 (!%p132_p0), %1064, %v1253_v4  }
  0x24   : > { %s163_s6 = scalar_select %p162_p1, %s1221_s28, 37  ;;  %v419_v58 = vstv %s418_s13 }
  0x25   : > { %s863_s13 = sshll.u32 %s154_s12, 1  ;;  %s917_s16 = sshll.u32 (%p1210_p10), %s1193_s20, 1 }
  0x26   : > { %s865_s7 = sshll.u32 %s163_s6, 3  ;;  %s156_s14 = scalar_lea.vmem [#allocation4], %s863_s13 }
  0x27   : > { %s1242_s10 = scalar_lea.vmem %s1428_s2, %s865_s7  ;;  %s789_s21 = ssub.s32 (%p1210_p10), 3, %s917_s16 }
  0x28   : > { %v192_v5 = vld [vmem:[%s1242_s10 + $0x80] sm:$0xff]  ;;  %v193_v6 = vld [vmem:[%s1242_s10 + $0x88] sm:$0xff]  ;;  %v194_v10 = vld [vmem:[%s1242_s10 + $0x90] sm:$0xff]  ;;  %p790_p2 = scmp.lt.s32.totalorder (%p1210_p10), %s789_s21, 2 }
  0x29   : > { %v176_v7 = vld [vmem:[%s1242_s10] sm:$0xff]  ;;  %v962_v8 = vpack.c.bf16 %v193_v6, %v192_v5  ;;  %v177_v9 = vld [vmem:[%s1242_s10 + $0x8] sm:$0xff]  ;;  %v195_v11 = vld [vmem:[%s1242_s10 + $0x98] sm:$0xff] }
  0x2a   : > { %v965_v12 = vpack.c.bf16 %v177_v9, %v176_v7  ;;  %v968_v13 = vpack.c.bf16 %v195_v11, %v194_v10  ;;  %v178_v14 = vld [vmem:[%s1242_s10 + $0x10] sm:$0xff]  ;;  %v179_v15 = vld [vmem:[%s1242_s10 + $0x18] sm:$0xff]  ;;  %v196_v16 = vld [vmem:[%s1242_s10 + $0xa0] sm:$0xff] }
  0x2b   : > { %964 = vmatprep.subr.msk.bf16.mxu0 %vm1246_vm1, %v962_v8  ;;  %v197_v17 = vld [vmem:[%s1242_s10 + $0xa8] sm:$0xff]  ;;  %v971_v18 = vpack.c.bf16 %v179_v15, %v178_v14  ;;  %v180_v20 = vld [vmem:[%s1242_s10 + $0x20] sm:$0xff]  ;;  %v198_v22 = vld [vmem:[%s1242_s10 + $0xb0] sm:$0xff] }
  0x2c   : > { %967 = vmatpush3.bf16.xpose.msk.msra.mxu0 %vm1246_vm1, %v965_v12  ;;  %v974_v19 = vpack.c.bf16 %v197_v17, %v196_v16  ;;  %v181_v21 = vld [vmem:[%s1242_s10 + $0x28] sm:$0xff]  ;;  %v199_v23 = vld [vmem:[%s1242_s10 + $0xb8] sm:$0xff]  ;;  %v182_v26 = vld [vmem:[%s1242_s10 + $0x30] sm:$0xff] }
  0x2d   : > { %970 = vmatprep.subr.msk.bf16.mxu0 %vm1246_vm1, %v968_v13  ;;  %v977_v24 = vpack.c.bf16 %v181_v21, %v180_v20  ;;  %v980_v25 = vpack.c.bf16 %v199_v23, %v198_v22  ;;  %v183_v27 = vld [vmem:[%s1242_s10 + $0x38] sm:$0xff]  ;;  %v200_v28 = vld [vmem:[%s1242_s10 + $0xc0] sm:$0xff]  ;;  %v201_v29 = vld [vmem:[%s1242_s10 + $0xc8] sm:$0xff] }
  0x2e   : > { %v983_v30 = vpack.c.bf16 %v183_v27, %v182_v26  ;;  %v986_v31 = vpack.c.bf16 %v201_v29, %v200_v28  ;;  %v184_v32 = vld [vmem:[%s1242_s10 + $0x40] sm:$0xff]  ;;  %v185_v33 = vld [vmem:[%s1242_s10 + $0x48] sm:$0xff]  ;;  %v202_v34 = vld [vmem:[%s1242_s10 + $0xd0] sm:$0xff] }
  0x2f   : > { %v203_v35 = vld [vmem:[%s1242_s10 + $0xd8] sm:$0xff]  ;;  %v989_v36 = vpack.c.bf16 %v185_v33, %v184_v32  ;;  %v186_v38 = vld [vmem:[%s1242_s10 + $0x50] sm:$0xff]  ;;  %v204_v40 = vld [vmem:[%s1242_s10 + $0xe0] sm:$0xff] }
  0x30   : > { %v992_v37 = vpack.c.bf16 %v203_v35, %v202_v34  ;;  %v187_v39 = vld [vmem:[%s1242_s10 + $0x58] sm:$0xff]  ;;  %v205_v41 = vld [vmem:[%s1242_s10 + $0xe8] sm:$0xff]  ;;  %v188_v44 = vld [vmem:[%s1242_s10 + $0x60] sm:$0xff] }
  0x31   : > { %v995_v42 = vpack.c.bf16 %v187_v39, %v186_v38  ;;  %v998_v43 = vpack.c.bf16 %v205_v41, %v204_v40  ;;  %v189_v45 = vld [vmem:[%s1242_s10 + $0x68] sm:$0xff]  ;;  %v206_v46 = vld [vmem:[%s1242_s10 + $0xf0] sm:$0xff]  ;;  %v207_v47 = vld [vmem:[%s1242_s10 + $0xf8] sm:$0xff] }
  0x32   : > { %v1001_v48 = vpack.c.bf16 %v189_v45, %v188_v44  ;;  %v1004_v49 = vpack.c.bf16 %v207_v47, %v206_v46  ;;  %v190_v50 = vld [vmem:[%s1242_s10 + $0x70] sm:$0xff]  ;;  %v191_v51 = vld [vmem:[%s1242_s10 + $0x78] sm:$0xff]  ;;  %v433_v21 = vld [vmem:[%s1427_s1 + $0x20] sm:$0xff] }
  0x33   : > { %v1007_v52 = vpack.c.bf16 %v191_v51, %v190_v50  ;;  %v434_v22 = vld [vmem:[%s1427_s1 + $0x28] sm:$0x7]  ;;  %v556_v45 = vld [vmem:[%s1427_s1 + $0x38] sm:$0xff]  ;;  %v557_v46 = vld [vmem:[%s1427_s1 + $0x40] sm:$0x7] }
  0x34   : > { %973 = vmatpush3.bf16.xpose.msk.msra.mxu0 %vm1246_vm1, %v971_v18 }
  0x35   : > { %976 = vmatprep.subr.msk.bf16.mxu0 %vm1246_vm1, %v974_v19  ;;  %v432_v19 = vld [vmem:[%s1427_s1 + $0x18] sm:$0xff] }
  0x3c   : > { %979 = vmatpush3.bf16.xpose.msk.msra.mxu0 %vm1246_vm1, %v977_v24  ;;  %v542_v24 = vstv %s906_s29 }
  0x3d   : > { %982 = vmatprep.subr.msk.bf16.mxu0 %vm1246_vm1, %v980_v25 }
  0x44   : > { %985 = vmatpush3.bf16.xpose.msk.msra.mxu0 %vm1246_vm1, %v983_v30 }
  0x45   : > { %988 = vmatprep.subr.msk.bf16.mxu0 %vm1246_vm1, %v986_v31 }
  0x4c   : > { %991 = vmatpush3.bf16.xpose.msk.msra.mxu0 %vm1246_vm1, %v989_v36 }
  0x4d   : > { %994 = vmatprep.subr.msk.bf16.mxu0 %vm1246_vm1, %v992_v37 }
  0x54   : > { %997 = vmatpush3.bf16.xpose.msk.msra.mxu0 %vm1246_vm1, %v995_v42 }
  0x55   : > { %1000 = vmatprep.subr.msk.bf16.mxu0 %vm1246_vm1, %v998_v43  ;;  %v555_v43 = vld [vmem:[%s1427_s1 + $0x30] sm:$0xff] }
  0x5c   : > { %1003 = vmatpush3.bf16.xpose.msk.msra.mxu0 %vm1246_vm1, %v1001_v48  ;;  %v663_v48 = vstv %s912_s9 }
  0x5d   : > { %1006 = vmatprep.subr.msk.bf16.mxu0 %vm1246_vm1, %v1004_v49 }
  0x64   : > { %1009 = vmatpush3.bf16.xpose.msk.msra.mxu0 %vm1246_vm1, %v1007_v52 }
  0x6b   : > { %957 = vmatmul.mubr.msk.f32.vlgmr.msra.gmra.mrb[0].mxu0 %vm226_vm0, %v1226_v0 }
  0x6c   : > { %958 = vmatprep.mubr.msk.f32.mxu0 %vm226_vm0, %v1253_v4 }
  0x6f   : > { %959 = vmatmul.mubr.msk.f32.gmra.mrb[2].mxu0 %vm226_vm0, %v1253_v4 }
  0x70   : > { %960 = vmatprep.mubr.msk.f32.mxu0 %vm226_vm0, %v1234_v1 }
  0x73   : > { %961 = vmatmul.mubr.msk.f32.gmra.mrb[4].mxu0 %vm226_vm0, %v1234_v1 }
  0x9d   : > { %v214_v54 = vpop.permute.xlu0 %213 }
  0x9e   : > { %v224_v4 = vpop.permute.xlu1 %223 }
  0xa1   : > { %v219_v60 = vpop.permute.xlu0 %218 }
 0x13e   : > { %v395_v55 = vpop.f32.mrb[0].mxu0 }
 0x13f   : > { %v396_v56 = vadd.f32 %v395_v55, %v214_v54  ;;  %v397_v57 = vpop.f32.mrb[1].mxu0 }
 0x140   : > { %v398_v59 = vadd.f32 %v397_v57, %v214_v54 }
 0x141   : > { %v420_v62 = vmul.f32 %v419_v58, %v396_v56  ;;  %vm412_vm2 = vcmp.ge.f32.partialorder %v396_v56, 0.0 }
 0x142   : > { %v401_v61 = vpop.f32.mrb[2].mxu0  ;;  %v421_v2 = vmul.f32 %v419_v58, %v398_v59  ;;  %vm413_vm3 = vcmp.ge.f32.partialorder %v398_v59, 0.0 }
 0x143   : > { %v402_v63 = vadd.f32 %v401_v61, %v219_v60  ;;  %v403_v0 = vpop.f32.mrb[3].mxu0  ;;  %v426_v9 = vsel %vm412_vm2, %v396_v56, %v420_v62 }
 0x144   : > { %v404_v3 = vadd.f32 %v403_v0, %v219_v60  ;;  %v427_v12 = vsel %vm413_vm3, %v398_v59, %v421_v2 }
 0x145   : > { %v422_v1 = vmul.f32 %v419_v58, %v402_v63  ;;  %vm414_vm4 = vcmp.ge.f32.partialorder %v402_v63, 0.0 }
 0x146   : > { %v423_v5 = vmul.f32 %v419_v58, %v404_v3  ;;  %v407_v6 = vpop.f32.mrb[4].mxu0  ;;  %vm415_vm5 = vcmp.ge.f32.partialorder %v404_v3, 0.0 }
 0x147   : > { %v408_v7 = vadd.f32 %v407_v6, %v224_v4  ;;  %v409_v8 = vpop.f32.mrb[5].mxu0  ;;  %v428_v10 = vsel %vm414_vm4, %v402_v63, %v422_v1 }
 0x148   : > { %v410_v11 = vadd.f32 %v409_v8, %v224_v4  ;;  %v429_v13 = vsel %vm415_vm5, %v404_v3, %v423_v5  ;;  %v1012_v14 = vpack.c.bf16 %v428_v10, %v426_v9  ;;  %v676_v4 = vld [vmem:[%s1427_s1 + $0x48] sm:$0x1]  ;;  %v1147_v5 = vmov 1966171168  }
 0x149   : > { %v1010_v15 = vpack.c.bf16 %v429_v13, %v427_v12  ;;  %v424_v17 = vmul.f32 %v419_v58, %v408_v7  ;;  %vm416_vm8 = vcmp.ge.f32.partialorder %v408_v7, 0.0  ;;  %v761_v6 = vunpack.c.l.s4 %v1147_v5 }
 0x14a   : > { %vm417_vm6 = vcmp.ge.f32.partialorder %v410_v11, 0.0  ;;  %v425_v16 = vmul.f32 %v419_v58, %v410_v11 }
 0x14b   : > { %1011 = vmatprep.subr.bf16.mxu1 %v1010_v15  ;;  %v430_v20 = vsel %vm416_vm8, %v408_v7, %v424_v17  ;;  %v763_v7 = vlaneseq  ;;  %v762_v8 = vunpack.c.0.s8 %v761_v6 }
 0x14c   : > { %1013 = vmatpush1.bf16.msra.mxu1 %v1012_v14  ;;  %v431_v18 = vsel %vm417_vm6, %v410_v11, %v425_v16 }
 0x14d   : > { %901 = vmatprep.subr.msk.mxu1 %vm445_vm7, %v431_v18  ;;  %v764_v9 = vshrl.u32 %v763_v7, 7  ;;  %vm777_vm6 = vcmp.lt.s32.totalorder %v763_v7, 256 }
 0x14f   : > { %v765_v11 = vsub.s32 %v762_v8, %v764_v9 }
 0x150   : > { %902 = vmatpush1.msk.msra.mxu1 %vm445_vm7, %v430_v20 }
 0x151   : > { %903 = vmatmul.mubr.msk.f32.vlgmr.msra.gmra.mrb[0].mxu1 %vm435_vm9, %v432_v19 }
 0x152   : > { %522 = vmatprep.mubr.f32.mxu1 %v1146_v53 }
 0x155   : > { %904 = vmatmul.mubr.msk.f32.gmra.mrb[2].mxu1 %vm435_vm9, %v433_v21 }
 0x156   : > { %528 = vmatprep.mubr.f32.mxu1 %v1146_v53 }
 0x159   : > { %905 = vmatmul.mubr.msk.f32.gmra.mrb[4].mxu1 %vm435_vm9, %v434_v22 }
 0x15a   : > { %637 = vmatprep.mubr.f32.mxu1 %v1146_v53 }
 0x224   : > { %v518_v23 = vpop.f32.mrb[0].mxu1 }
 0x225   : > { %v520_v25 = vpop.f32.mrb[1].mxu1  ;;  %v543_v26 = vmul.f32 %v542_v24, %v518_v23  ;;  %vm535_vm10 = vcmp.ge.f32.partialorder %v518_v23, 0.0 }
 0x226   : > { %v544_v27 = vmul.f32 %v542_v24, %v520_v25  ;;  %vm536_vm11 = vcmp.ge.f32.partialorder %v520_v25, 0.0 }
 0x227   : > { %v549_v32 = vsel %vm535_vm10, %v518_v23, %v543_v26 }
 0x228   : > { %v524_v28 = vpop.f32.mrb[2].mxu1  ;;  %v550_v34 = vsel %vm536_vm11, %v520_v25, %v544_v27 }
 0x229   : > { %vm537_vm12 = vcmp.ge.f32.partialorder %v524_v28, 0.0  ;;  %v545_v29 = vmul.f32 %v542_v24, %v524_v28  ;;  %v526_v30 = vpop.f32.mrb[3].mxu1 }
 0x22a   : > { %vm538_vm13 = vcmp.ge.f32.partialorder %v526_v30, 0.0  ;;  %v546_v31 = vmul.f32 %v542_v24, %v526_v30 }
 0x22b   : > { %v551_v33 = vsel %vm537_vm12, %v524_v28, %v545_v29 }
 0x22c   : > { %v1016_v35 = vpack.c.bf16 %v551_v33, %v549_v32  ;;  %v552_v36 = vsel %vm538_vm13, %v526_v30, %v546_v31  ;;  %v530_v37 = vpop.f32.mrb[4].mxu1 }
 0x22d   : > { %v532_v38 = vpop.f32.mrb[5].mxu1  ;;  %v1014_v39 = vpack.c.bf16 %v552_v36, %v550_v34  ;;  %v547_v41 = vmul.f32 %v542_v24, %v530_v37  ;;  %vm539_vm15 = vcmp.ge.f32.partialorder %v530_v37, 0.0 }
 0x22e   : > { %vm540_vm14 = vcmp.ge.f32.partialorder %v532_v38, 0.0  ;;  %v548_v40 = vmul.f32 %v542_v24, %v532_v38 }
 0x22f   : > { %1015 = vmatprep.subr.bf16.mxu1 %v1014_v39  ;;  %v553_v44 = vsel %vm539_vm15, %v530_v37, %v547_v41 }
 0x230   : > { %1017 = vmatpush1.bf16.msra.mxu1 %v1016_v35  ;;  %v554_v42 = vsel %vm540_vm14, %v532_v38, %v548_v40 }
 0x231   : > { %907 = vmatprep.subr.msk.mxu1 %vm445_vm7, %v554_v42 }
 0x234   : > { %908 = vmatpush1.msk.msra.mxu1 %vm445_vm7, %v553_v44 }
 0x235   : > { %909 = vmatmul.mubr.msk.f32.vlgmr.msra.gmra.mrb[6].mxu1 %vm435_vm9, %v555_v43 }
 0x236   : > { %643 = vmatprep.mubr.f32.mxu1 %v1146_v53 }
 0x239   : > { %910 = vmatmul.mubr.msk.f32.gmra.mrb[8].mxu1 %vm435_vm9, %v556_v45 }
 0x23a   : > { %649 = vmatprep.mubr.f32.mxu1 %v1146_v53 }
 0x23d   : > { %911 = vmatmul.mubr.msk.f32.gmra.mrb[10].mxu1 %vm435_vm9, %v557_v46 }
 0x23e   : > { %750 = vmatprep.mubr.f32.mxu1 %v1146_v53 }
 0x308   : > { %v639_v47 = vpop.f32.mrb[6].mxu1 }
 0x309   : > { %v641_v49 = vpop.f32.mrb[7].mxu1  ;;  %v664_v50 = vmul.f32 %v663_v48, %v639_v47  ;;  %vm656_vm0 = vcmp.ge.f32.partialorder %v639_v47, 0.0 }
 0x30a   : > { %v665_v51 = vmul.f32 %v663_v48, %v641_v49  ;;  %vm657_vm1 = vcmp.ge.f32.partialorder %v641_v49, 0.0 }
 0x30b   : > { %v670_v57 = vsel %vm656_vm0, %v639_v47, %v664_v50 }
 0x30c   : > { %v645_v52 = vpop.f32.mrb[8].mxu1  ;;  %v671_v59 = vsel %vm657_vm1, %v641_v49, %v665_v51 }
 0x30d   : > { %vm658_vm2 = vcmp.ge.f32.partialorder %v645_v52, 0.0  ;;  %v666_v54 = vmul.f32 %v663_v48, %v645_v52  ;;  %v647_v55 = vpop.f32.mrb[9].mxu1 }
 0x30e   : > { %vm659_vm3 = vcmp.ge.f32.partialorder %v647_v55, 0.0  ;;  %v667_v56 = vmul.f32 %v663_v48, %v647_v55 }
 0x30f   : > { %v672_v58 = vsel %vm658_vm2, %v645_v52, %v666_v54 }
 0x310   : > { %v1020_v60 = vpack.c.bf16 %v672_v58, %v670_v57  ;;  %v673_v61 = vsel %vm659_vm3, %v647_v55, %v667_v56  ;;  %v651_v53 = vpop.f32.mrb[10].mxu1 }
 0x311   : > { %v653_v62 = vpop.f32.mrb[11].mxu1  ;;  %v1018_v63 = vpack.c.bf16 %v673_v61, %v671_v59  ;;  %v668_v2 = vmul.f32 %v663_v48, %v651_v53  ;;  %vm660_vm5 = vcmp.ge.f32.partialorder %v651_v53, 0.0 }
 0x312   : > { %vm661_vm4 = vcmp.ge.f32.partialorder %v653_v62, 0.0  ;;  %v669_v0 = vmul.f32 %v663_v48, %v653_v62 }
 0x313   : > { %1019 = vmatprep.subr.bf16.mxu1 %v1018_v63  ;;  %v674_v1 = vsel %vm660_vm5, %v651_v53, %v668_v2 }
 0x314   : > { %1021 = vmatpush1.bf16.msra.mxu1 %v1020_v60  ;;  %v675_v3 = vsel %vm661_vm4, %v653_v62, %v669_v0 }
 0x315   : > { %913 = vmatprep.subr.msk.mxu1 %vm445_vm7, %v675_v3 }
 0x318   : > { %914 = vmatpush1.msk.msra.mxu1 %vm445_vm7, %v674_v1 }
 0x319   : > { %915 = vmatmul.mubr.msk.f32.vlgmr.msra.gmra.mrb[12].mxu1 %vm435_vm9, %v676_v4 }
 0x3ec   : > { %v752_v10 = vpop.f32.mrb[12].mxu1 }
 0x3ed   : > { %v754_v12 = vpop.f32.mrb[13].mxu1 }
 0x3ee   : > { %v759_v13 = vcombine.low %v752_v10, %v754_v12  ;;  %787 = sbr.rel (!%p1210_p10) target bundleno = 1040 (0x410), region = 32 }
 0x3f0   : > { %v766_v14 = vrot.slane %v759_v13, %v765_v11 }
 0x3f2   : > { %v773_v15 = vrot.slane %v766_v14, %v765_v11 }
 0x3f4   : > { %779 = vst.msk [vmem:[%s156_s14] sm:$0x3] %vm777_vm6, %v773_v15 }
 0x3f5   : > { %s1439_s21 = smov (!%p790_p2, %s789_s21), 2 }
 0x3f6   : > { %s1377_s23 = sshll.u32 %s1439_s21, 4 }
 0x3f7   : > { %s794_s24 = ssub.s32 32, %s1377_s23 }
 0x3f8   : > { %795 = vsyncadd %s1372_s15, %s794_s24  ;;  %p919_p3 = scmp.ne.s32.totalorder %s1377_s23, 0  ;;  %s1386_s26 = scalar_lea.hbm %s1429_s3, %s1221_s28 }
 0x3f9   : > { %s800_s4 = sshll.u32 %s156_s14, 4  ;;  %s1148_s5 = smov [#allocation4]   ;;  %s801_s4 = int_to_ptr.vmem [resolvable:$true] %s800_s4 }
 0x3fa   : > { %s1078_s20 = scalar_lea.vmem %s801_s4, %s1377_s23  ;;  %s1082_s6 = sshll.u32 %s1148_s5, 4  ;;  %s1083_s6 = int_to_ptr.vmem [resolvable:$false] %s1082_s6 }
 0x3fb   : > { %p1079_p4 = scmp.ne.s32.totalorder %s801_s4, %s1078_s20  ;;  %s1084_s7 = scalar_lea.vmem %s1083_s6, 64 }
 0x3fc   : > { %p1085_p7 = scmp.lt.s32.totalorder %s801_s4, %s1083_s6  ;;  %p1086_p8 = scmp.lt.s32.totalorder %s1084_s7, %s1078_s20 }
 0x3fd   : > { %p1080_p5 = pnand %p1079_p4, %p919_p3 }
 0x3fe   : > { %p1087_p9 = por %p1086_p8, %p1085_p7 }
 0x3ff   : > { %p1081_p6 = pneg %p1080_p5 }
 0x401   : > { %p1088_p10 = pnand %p1087_p9, %p1081_p6 }
 0x403   : > { %1091 = shalt.err (!%p1088_p10)
}
 0x404   : > { %s1092_s28 = scalar_lea.hbm %s1386_s26, %s1377_s23  ;;  %s1096_s10 = scalar_lea.hbm %s1429_s3, 48 }
 0x405   : > { %p1093_p12 = scmp.ne.s32.totalorder %s1386_s26, %s1092_s28  ;;  %p1097_p1 = scmp.lt.u32.totalorder %s1386_s26, %s1429_s3 }
 0x406   : > { %p1098_p2 = scmp.lt.u32.totalorder %s1096_s10, %s1092_s28  ;;  %p1100_p5 = scmp.lt.u32.totalorder %s1092_s28, %s1386_s26 }
 0x407   : > { %p1094_p13 = pnand %p1093_p12, %p919_p3 }
 0x408   : > { %p1099_p4 = por %p1098_p2, %p1097_p1 }
 0x409   : > { %p1095_p0 = pneg %p1094_p13 }
 0x40a   : > { %p1101_p6 = por %p1100_p5, %p1099_p4 }
 0x40c   : > { %p1102_p7 = pnand %p1101_p6, %p1095_p0 }
 0x40e   : > { %1105 = shalt.err (!%p1102_p7)
}
 0x40f   : > { %803 = dma.vmem_to_hbm [thread:$0]  (%p919_p3), %s801_s4, %s1377_s23, %s1386_s26, %s1372_s15  }
 0x410 PF: > { %p1027_p8 = scmp.ge.s32.totalorder %s1142_s19, 2  ;;  %s812_s13 = sand.u32 1, %s1130_s17  }
 0x411   : > { %s813_s14 = scalar_lea.sflag [#allocation5], %s812_s13 }
 0x412   : > { %p1024_p9 = pnand %p1027_p8, %p1214_p11 }
 0x414   : > { %1125 = dma.done.wait (!%p1024_p9), %s813_s14, 32  }
 0x415   : > { %1127 = vsyncadd (!%p1024_p9), %s813_s14, 4294967264  ;;  %p19_p10 = scmp.ge.s32.totalorder %s1197_s22, 4   ;;  %s1434_s17 = smov %s1134_s18 }
 0x416   : > { %s1435_s18 = smov %s1138_s0  ;;  %s1436_s0 = smov %s1208_s25 }
 0x417   : > { %s1437_s19 = smov %s1197_s22  ;;  %21 = sbr.rel (!%p19_p10) target bundleno = 18 (0x12), region = 63 }
 0x41e   :  { %818 = vsyncpa [#allocation5], 1 }
 0x41f   :  { %820 = vsyncpa [#allocation5 + $0x1], 1 }

</bundles_post_ra>
